<compile_context>
chip_gen: v7x
topology: tpu7x:2x2x1
jax: 0.10.0
libtpu: 0.0.40
codegen_flags: <defaults>
</compile_context>

<pallas_src>
import functools

import jax
import jax.numpy as jnp
from jax.experimental import pallas as pl
from jax.experimental.pallas import tpu as pltpu

LANE = 128
SUBLANE = 8
VMEM_SPEC = pl.BlockSpec(memory_space=pltpu.MemorySpace.VMEM)


# ----------------------------------------------------------------------------
# Parameter packing: one lane-dense slab, static row offsets
# ----------------------------------------------------------------------------
def pack_param_slab(named_params):
    """Pack small 2-D params into one (rows, width) f32 slab; return layout."""
    width = max(p.shape[1] for _, p in named_params)
    width = ((width + LANE - 1) // LANE) * LANE
    layout = {}
    blocks = []
    row = 0
    for name, p in named_params:
        r, c = p.shape
        rp = ((r + SUBLANE - 1) // SUBLANE) * SUBLANE
        layout[name] = (row, r, c)
        blocks.append(jnp.pad(p.astype(jnp.float32),
                              ((0, rp - r), (0, width - c))))
        row += rp
    return jnp.concatenate(blocks, axis=0), layout


# ----------------------------------------------------------------------------
# Fused Pallas kernel (whole forward pass)
# ----------------------------------------------------------------------------
def _make_gcn_kernel(layout, n_gconv, E, mxu_dtype):
    """Fused forward kernel; `layout` maps param name -> (row_off, rows, cols)."""

    def getp(slab_ref, name):
        r0, r, c = layout[name]
        return slab_ref[r0:r0 + r, :c]          # static slice -> cheap view/load

    def mx(v):                                   # cast MXU operand only
        return v.astype(mxu_dtype)

    def kernel(x_ref, en_ref, src_ref, dstr_ref, slab_ref, o_ref):
        f32 = jnp.float32
        N = x_ref.shape[0]

        # ---- 1. edge net: shared 2-layer MLP on stacked halves + cosine sim
        #        (section 1 stays f32: tiny matmuls, keeps edge weights exact)
        ew1 = getp(slab_ref, "ew1"); eb1 = getp(slab_ref, "eb1")
        ew2 = getp(slab_ref, "ew2"); eb2 = getp(slab_ref, "eb2")
        h = jnp.dot(en_ref[...], ew1, preferred_element_type=f32) + eb1
        h = jnp.maximum(h, 0.0)
        h = jnp.dot(h, ew2, preferred_element_type=f32) + eb2      # (2E, H)
        h1 = h[:E, :]
        h2 = h[E:, :]
        num = jnp.sum(h1 * h2, axis=-1, keepdims=True)
        ss = (jnp.sum(h1 * h1, axis=-1, keepdims=True)
              * jnp.sum(h2 * h2, axis=-1, keepdims=True))
        w_col = 0.5 * (num * jax.lax.rsqrt(ss + 1e-16) + 1.0)       # (E, 1) f32

        # ---- 2. adjacency: ONE matmul + row-sum degree + broadcast scaling
        col_iota = jax.lax.broadcasted_iota(jnp.int32, (E, N), 1)
        S = (src_ref[...] == col_iota).astype(f32)                  # (E, N)
        row_iota = jax.lax.broadcasted_iota(jnp.int32, (N, E), 0)
        D_T = (dstr_ref[...] == row_iota).astype(mxu_dtype)         # (N, E), exact
        A_w = jnp.dot(D_T, mx(S * w_col), preferred_element_type=f32)   # (N, N)

        deg_col = jnp.sum(A_w, axis=1, keepdims=True) + 1.0         # (N, 1) + self loop
        dinv_col = jax.lax.rsqrt(deg_col)                           # (N, 1) f32

        # Left-normalized adjacency with self loops; the right dinv factor is
        # folded into the per-layer feature scaling below.
        ri = jax.lax.broadcasted_iota(jnp.int32, (N, N), 0)
        ci = jax.lax.broadcasted_iota(jnp.int32, (N, N), 1)
        adj_l = dinv_col * A_w
        adj_l = jnp.where(ri == ci, adj_l + dinv_col, adj_l)        # diag += dinv[d]

        # ---- 3. GCNConv + ReLU stack (dropout = identity in eval mode)
        h = x_ref[...]
        for i in range(n_gconv):
            gw = getp(slab_ref, f"gw{i}")
            gb = getp(slab_ref, f"gb{i}")
            xw = jnp.dot(mx(h), mx(gw), preferred_element_type=f32)
            xw = dinv_col * xw                    # right symmetric-norm factor
            h = jnp.maximum(
                jnp.dot(mx(adj_l), mx(xw), preferred_element_type=f32) + gb, 0.0)

        # ---- 4. cls head: Linear -> ReLU -> (BN folded) Linear, lane-dense out
        cw1 = getp(slab_ref, "cw1"); cb1 = getp(slab_ref, "cb1")
        cw2 = getp(slab_ref, "cw2"); cb2 = getp(slab_ref, "cb2")
        z = jnp.maximum(
            jnp.dot(mx(h), mx(cw1), preferred_element_type=f32) + cb1, 0.0)
        o_ref[...] = jnp.dot(mx(z), mx(cw2), preferred_element_type=f32) + cb2

    return kernel


# ----------------------------------------------------------------------------
# Wrapper
# ----------------------------------------------------------------------------
def fold_cls_params(cls_params, pad_to=LANE):
    """Fold eval-mode BatchNorm1d into the second Linear and pad to 128 lanes."""
    w1, b1, gamma, beta, rmean, rvar, w2, b2 = cls_params
    s = gamma * jax.lax.rsqrt(rvar + 1e-5)          # (1, H)
    t = beta - rmean * s                            # (1, H)
    w2f = w2 * s.reshape(-1, 1)                     # (H, C)
    b2f = t @ w2 + b2                               # (1, C)
    c = w2.shape[1]
    pad = pad_to - c
    w2p = jnp.pad(w2f, ((0, 0), (0, pad)))
    b2p = jnp.pad(b2f, ((0, 0), (0, pad)))
    return (w1, b1, w2p, b2p)


@functools.partial(jax.jit, static_argnames=("num_classes", "mxu_dtype"))
def gcn_forward(x, edge_index, edgenet_input, enc_params, gconv_params,
                cls_folded, *, num_classes, mxu_dtype=jnp.bfloat16):
    N = x.shape[0]
    E, two_d = edgenet_input.shape
    d_enc = two_d // 2
    n_gconv = len(gconv_params)

    # Stack both halves of the edge feature -> one shared-MLP pass in-kernel.
    en_stacked = jnp.concatenate(
        [edgenet_input[:, :d_enc], edgenet_input[:, d_enc:]], axis=0)  # (2E, d)

    src_col = edge_index[0].astype(jnp.int32).reshape(E, 1)
    dst_row = edge_index[1].astype(jnp.int32).reshape(1, E)

    # Pack all small parameter tensors into ONE lane-dense slab (one DMA).
    named = [("ew1", enc_params[0]), ("eb1", enc_params[1]),
             ("ew2", enc_params[2]), ("eb2", enc_params[3])]
    for i, (gw, gb) in enumerate(gconv_params):
        named += [(f"gw{i}", gw), (f"gb{i}", gb)]
    cw1, cb1, cw2p, cb2p = cls_folded
    named += [("cw1", cw1), ("cb1", cb1), ("cw2", cw2p), ("cb2", cb2p)]
    slab, layout = pack_param_slab(named)

    out = pl.pallas_call(
        _make_gcn_kernel(layout, n_gconv, E, mxu_dtype),
        out_shape=jax.ShapeDtypeStruct((N, LANE), jnp.float32),
        in_specs=[VMEM_SPEC] * 5,
        out_specs=VMEM_SPEC,
    )(x, en_stacked, src_col, dst_row, slab)
    return out[:, :num_classes]


# ----------------------------------------------------------------------------
# Pure-JAX reference (scatter-based gcn_norm, explicit BN) for validation
# ----------------------------------------------------------------------------
def gcn_reference(x, edge_index, edgenet_input, enc_params, gconv_params,
                  cls_params):
    ew1, eb1, ew2, eb2 = enc_params
    d = edgenet_input.shape[1] // 2
    x1, x2 = edgenet_input[:, :d], edgenet_input[:, d:]

    def proj(v):
        h = jnp.maximum(v @ ew1 + eb1, 0.0)
        return h @ ew2 + eb2

    h1, h2 = proj(x1), proj(x2)
    num = jnp.sum(h1 * h2, axis=-1)
    den = jnp.sqrt(jnp.sum(h1 * h1, -1) * jnp.sum(h2 * h2, -1)) + 1e-8
    w = 0.5 * (num / den + 1.0)

    N = x.shape[0]
    src, dst = edge_index[0], edge_index[1]
    loop = jnp.arange(N, dtype=src.dtype)
    src_a = jnp.concatenate([src, loop])
    dst_a = jnp.concatenate([dst, loop])
    wa = jnp.concatenate([w, jnp.ones((N,), jnp.float32)])
    deg = jnp.zeros((N,), jnp.float32).at[dst_a].add(wa)
    dinv = jnp.where(deg > 0, jax.lax.rsqrt(deg), 0.0)
    norm = dinv[src_a] * wa * dinv[dst_a]
    adj = jnp.zeros((N, N), jnp.float32).at[dst_a, src_a].add(norm)

    h = x
    for (gw, gb) in gconv_params:
        h = jnp.maximum(adj @ (h @ gw) + gb, 0.0)

    w1, b1, gamma, beta, rmean, rvar, w2, b2 = cls_params
    z = jnp.maximum(h @ w1 + b1, 0.0)
    z = (z - rmean) * jax.lax.rsqrt(rvar + 1e-5) * gamma + beta
    return z @ w2 + b2


# ----------------------------------------------------------------------------
# Parameter init (matches PyTorch model_init: kaiming Lin, zero bias; glorot GCN)
# ----------------------------------------------------------------------------
def kaiming_linear(key, fan_in, fan_out):
    std = (2.0 / fan_in) ** 0.5
    w = std * jax.random.normal(key, (fan_in, fan_out), jnp.float32)
    b = jnp.zeros((1, fan_out), jnp.float32)
    return w, b


def glorot_linear(key, fan_in, fan_out):
    lim = (6.0 / (fan_in + fan_out)) ** 0.5
    w = jax.random.uniform(key, (fan_in, fan_out), jnp.float32, -lim, lim)
    b = jnp.zeros((1, fan_out), jnp.float32)
    return w, b


# ----------------------------------------------------------------------------
# Main
# ----------------------------------------------------------------------------
if __name__ == "__main__":
    key = jax.random.PRNGKey(0)

    # Module hyper-parameters (small, consistent with the forward pass).
    N = 16                      # number of graph nodes
    E = 48                      # number of edges
    input_dim = 32
    hgc = (32, 32)              # hidden channels per GCN layer
    num_classes = 4
    edgenet_input_dim = 16      # encoder sees edgenet_input_dim // 2 = 8
    ehidden = 16

    keys = jax.random.split(key, 12)

    # ---- parameters ----
    d_enc = edgenet_input_dim // 2
    ew1, eb1 = kaiming_linear(keys[0], d_enc, ehidden)
    ew2, eb2 = kaiming_linear(keys[1], ehidden, ehidden)
    enc_params = (ew1, eb1, ew2, eb2)

    gconv_params = []
    in_c = input_dim
    for i, out_c in enumerate(hgc):
        gw, gb = glorot_linear(keys[2 + i], in_c, out_c)
        gconv_params.append((gw, gb))
        in_c = out_c
    gconv_params = tuple(gconv_params)

    cw1, cb1 = kaiming_linear(keys[6], hgc[-1], 256)
    cw2, cb2 = kaiming_linear(keys[7], 256, num_classes)
    gamma = jnp.ones((1, 256), jnp.float32)
    beta = jnp.zeros((1, 256), jnp.float32)
    rmean = jnp.zeros((1, 256), jnp.float32)
    rvar = jnp.ones((1, 256), jnp.float32)
    cls_params = (cw1, cb1, gamma, beta, rmean, rvar, cw2, cb2)
    cls_folded = fold_cls_params(cls_params)     # BN folded, padded to 128 lanes

    # ---- inputs ----
    x = jax.random.normal(keys[8], (N, input_dim), jnp.float32)
    src = jax.random.randint(keys[9], (E,), 0, N, dtype=jnp.int32)
    off = jax.random.randint(keys[10], (E,), 1, N, dtype=jnp.int32)
    dst = (src + off) % N                        # no self loops in raw edge list
    edge_index = jnp.stack([src, dst], axis=0)   # (2, E)
    edgenet_input = jax.random.normal(keys[11], (E, edgenet_input_dim),
                                      jnp.float32)

    with jax.default_matmul_precision("float32"):
        ref = gcn_reference(x, edge_index, edgenet_input, enc_params,
                            gconv_params, cls_params)

    # f32 MXU-operand mode: tight algorithmic check against the reference.
    logit_f32 = gcn_forward(x, edge_index, edgenet_input, enc_params,
                            gconv_params, cls_folded, num_classes=num_classes,
                            mxu_dtype=jnp.float32)
    jax.block_until_ready(logit_f32)
    assert logit_f32.shape == (N, num_classes)
    assert bool(jnp.all(jnp.isfinite(logit_f32)))
    assert bool(jnp.allclose(logit_f32, ref, rtol=1e-3, atol=1e-3)), \
        float(jnp.max(jnp.abs(logit_f32 - ref)))

    # bf16 MXU-operand mode (default / perf path for v6e & v7x): looser tol.
    logit_bf16 = gcn_forward(x, edge_index, edgenet_input, enc_params,
                             gconv_params, cls_folded, num_classes=num_classes,
                             mxu_dtype=jnp.bfloat16)
    jax.block_until_ready(logit_bf16)
    assert logit_bf16.shape == (N, num_classes)
    assert bool(jnp.all(jnp.isfinite(logit_bf16)))
    assert bool(jnp.allclose(logit_bf16, ref, rtol=3e-2, atol=3e-2)), \
        float(jnp.max(jnp.abs(logit_bf16 - ref)))

    print("KERNEL_OK")
</pallas_src>

<mosaic_0001>
module attributes {stable_mosaic.version = 11 : i64} {
  func.func @kernel(%arg0: memref<16x32xf32, #tpu.memory_space<vmem>>, %arg1: memref<96x8xf32, #tpu.memory_space<vmem>>, %arg2: memref<48x1xi32, #tpu.memory_space<vmem>>, %arg3: memref<1x48xi32, #tpu.memory_space<vmem>>, %arg4: memref<424x256xf32, #tpu.memory_space<vmem>>, %arg5: memref<16x128xf32, #tpu.memory_space<vmem>>) attributes {dimension_semantics = [], scalar_prefetch = 0 : i64, scratch_operands = 0 : i64, tpu.core_type = #tpu.core_type<tc>} {
    %c0 = arith.constant 0 : index
    %c0_0 = arith.constant 0 : index
    %0 = vector.load %arg4[%c0, %c0_0] : memref<424x256xf32, #tpu.memory_space<vmem>>, vector<8x16xf32>
    %c8 = arith.constant 8 : index
    %c0_1 = arith.constant 0 : index
    %1 = vector.load %arg4[%c8, %c0_1] : memref<424x256xf32, #tpu.memory_space<vmem>>, vector<1x16xf32>
    %c16 = arith.constant 16 : index
    %c0_2 = arith.constant 0 : index
    %2 = vector.load %arg4[%c16, %c0_2] : memref<424x256xf32, #tpu.memory_space<vmem>>, vector<16x16xf32>
    %c32 = arith.constant 32 : index
    %c0_3 = arith.constant 0 : index
    %3 = vector.load %arg4[%c32, %c0_3] : memref<424x256xf32, #tpu.memory_space<vmem>>, vector<1x16xf32>
    %c0_4 = arith.constant 0 : index
    %c0_5 = arith.constant 0 : index
    %4 = vector.load %arg1[%c0_4, %c0_5] : memref<96x8xf32, #tpu.memory_space<vmem>>, vector<96x8xf32>
    %cst = arith.constant dense<0.000000e+00> : vector<96x16xf32>
    %5 = tpu.matmul %4, %0, %cst {dimension_numbers = #tpu.dot_dimension_numbers<[1], [0], [0], [1], [0, 0, 1, 1], [], []>} : vector<96x8xf32>, vector<8x16xf32>, vector<96x16xf32> -> vector<96x16xf32>
    %6 = vector.broadcast %1 : vector<1x16xf32> to vector<96x16xf32>
    %7 = arith.addf %5, %6 : vector<96x16xf32>
    %cst_6 = arith.constant 0.000000e+00 : f32
    %8 = vector.broadcast %cst_6 : f32 to vector<96x16xf32>
    %9 = arith.maximumf %7, %8 : vector<96x16xf32>
    %cst_7 = arith.constant dense<0.000000e+00> : vector<96x16xf32>
    %10 = tpu.matmul %9, %2, %cst_7 {dimension_numbers = #tpu.dot_dimension_numbers<[1], [0], [0], [1], [0, 0, 1, 1], [], []>} : vector<96x16xf32>, vector<16x16xf32>, vector<96x16xf32> -> vector<96x16xf32>
    %11 = vector.broadcast %3 : vector<1x16xf32> to vector<96x16xf32>
    %12 = arith.addf %10, %11 : vector<96x16xf32>
    %13 = vector.extract_strided_slice %12 {offsets = [0, 0], sizes = [48, 16], strides = [1, 1]} : vector<96x16xf32> to vector<48x16xf32>
    %14 = vector.extract_strided_slice %12 {offsets = [48, 0], sizes = [48, 16], strides = [1, 1]} : vector<96x16xf32> to vector<48x16xf32>
    %15 = arith.mulf %13, %14 : vector<48x16xf32>
    %cst_8 = arith.constant dense<0.000000e+00> : vector<48xf32>
    %16 = vector.multi_reduction <add>, %15, %cst_8 [1] : vector<48x16xf32> to vector<48xf32>
    %17 = vector.shape_cast %16 : vector<48xf32> to vector<48x1xf32>
    %18 = arith.mulf %13, %13 : vector<48x16xf32>
    %cst_9 = arith.constant dense<0.000000e+00> : vector<48xf32>
    %19 = vector.multi_reduction <add>, %18, %cst_9 [1] : vector<48x16xf32> to vector<48xf32>
    %20 = vector.shape_cast %19 : vector<48xf32> to vector<48x1xf32>
    %21 = arith.mulf %14, %14 : vector<48x16xf32>
    %cst_10 = arith.constant dense<0.000000e+00> : vector<48xf32>
    %22 = vector.multi_reduction <add>, %21, %cst_10 [1] : vector<48x16xf32> to vector<48xf32>
    %23 = vector.shape_cast %22 : vector<48xf32> to vector<48x1xf32>
    %24 = arith.mulf %20, %23 : vector<48x1xf32>
    %cst_11 = arith.constant 1.000000e-16 : f32
    %25 = vector.broadcast %cst_11 : f32 to vector<48x1xf32>
    %26 = arith.addf %24, %25 : vector<48x1xf32>
    %27 = math.rsqrt %26 : vector<48x1xf32>
    %28 = arith.mulf %17, %27 : vector<48x1xf32>
    %cst_12 = arith.constant 1.000000e+00 : f32
    %29 = vector.broadcast %cst_12 : f32 to vector<48x1xf32>
    %30 = arith.addf %28, %29 : vector<48x1xf32>
    %cst_13 = arith.constant 5.000000e-01 : f32
    %31 = vector.broadcast %cst_13 : f32 to vector<48x1xf32>
    %32 = arith.mulf %31, %30 : vector<48x1xf32>
    %33 = tpu.iota {dimensions = array<i32: 1>} : vector<48x16xi32>
    %c0_14 = arith.constant 0 : index
    %c0_15 = arith.constant 0 : index
    %34 = vector.load %arg2[%c0_14, %c0_15] : memref<48x1xi32, #tpu.memory_space<vmem>>, vector<48x1xi32>
    %35 = vector.broadcast %34 : vector<48x1xi32> to vector<48x16xi32>
    %36 = arith.cmpi eq, %35, %33 : vector<48x16xi32>
    %37 = arith.extui %36 : vector<48x16xi1> to vector<48x16xi32>
    %38 = arith.sitofp %37 : vector<48x16xi32> to vector<48x16xf32>
    %39 = tpu.iota {dimensions = array<i32: 0>} : vector<16x48xi32>
    %c0_16 = arith.constant 0 : index
    %c0_17 = arith.constant 0 : index
    %40 = vector.load %arg3[%c0_16, %c0_17] : memref<1x48xi32, #tpu.memory_space<vmem>>, vector<1x48xi32>
    %41 = vector.broadcast %40 : vector<1x48xi32> to vector<16x48xi32>
    %42 = arith.cmpi eq, %41, %39 : vector<16x48xi32>
    %43 = arith.extui %42 : vector<16x48xi1> to vector<16x48xi32>
    %44 = arith.sitofp %43 : vector<16x48xi32> to vector<16x48xf32>
    %45 = vector.broadcast %32 : vector<48x1xf32> to vector<48x16xf32>
    %46 = arith.mulf %38, %45 : vector<48x16xf32>
    %cst_18 = arith.constant dense<0.000000e+00> : vector<16x16xf32>
    %47 = tpu.matmul %44, %46, %cst_18 {dimension_numbers = #tpu.dot_dimension_numbers<[1], [0], [0], [1], [0, 0, 1, 1], [], []>} : vector<16x48xf32>, vector<48x16xf32>, vector<16x16xf32> -> vector<16x16xf32>
    %cst_19 = arith.constant dense<0.000000e+00> : vector<16xf32>
    %48 = vector.multi_reduction <add>, %47, %cst_19 [1] : vector<16x16xf32> to vector<16xf32>
    %49 = vector.shape_cast %48 : vector<16xf32> to vector<16x1xf32>
    %cst_20 = arith.constant 1.000000e+00 : f32
    %50 = vector.broadcast %cst_20 : f32 to vector<16x1xf32>
    %51 = arith.addf %49, %50 : vector<16x1xf32>
    %52 = math.rsqrt %51 : vector<16x1xf32>
    %53 = tpu.iota {dimensions = array<i32: 0>} : vector<16x16xi32>
    %54 = tpu.iota {dimensions = array<i32: 1>} : vector<16x16xi32>
    %55 = vector.broadcast %52 : vector<16x1xf32> to vector<16x16xf32>
    %56 = arith.mulf %55, %47 : vector<16x16xf32>
    %57 = arith.cmpi eq, %53, %54 : vector<16x16xi32>
    %58 = vector.broadcast %52 : vector<16x1xf32> to vector<16x16xf32>
    %59 = arith.addf %56, %58 : vector<16x16xf32>
    %60 = arith.select %57, %59, %56 : vector<16x16xi1>, vector<16x16xf32>
    %c0_21 = arith.constant 0 : index
    %c0_22 = arith.constant 0 : index
    %61 = vector.load %arg0[%c0_21, %c0_22] : memref<16x32xf32, #tpu.memory_space<vmem>>, vector<16x32xf32>
    %c40 = arith.constant 40 : index
    %c0_23 = arith.constant 0 : index
    %62 = vector.load %arg4[%c40, %c0_23] : memref<424x256xf32, #tpu.memory_space<vmem>>, vector<32x32xf32>
    %c72 = arith.constant 72 : index
    %c0_24 = arith.constant 0 : index
    %63 = vector.load %arg4[%c72, %c0_24] : memref<424x256xf32, #tpu.memory_space<vmem>>, vector<1x32xf32>
    %cst_25 = arith.constant dense<0.000000e+00> : vector<16x32xf32>
    %64 = tpu.matmul %61, %62, %cst_25 {dimension_numbers = #tpu.dot_dimension_numbers<[1], [0], [0], [1], [0, 0, 1, 1], [], []>} : vector<16x32xf32>, vector<32x32xf32>, vector<16x32xf32> -> vector<16x32xf32>
    %65 = vector.broadcast %52 : vector<16x1xf32> to vector<16x32xf32>
    %66 = arith.mulf %65, %64 : vector<16x32xf32>
    %cst_26 = arith.constant dense<0.000000e+00> : vector<16x32xf32>
    %67 = tpu.matmul %60, %66, %cst_26 {dimension_numbers = #tpu.dot_dimension_numbers<[1], [0], [0], [1], [0, 0, 1, 1], [], []>} : vector<16x16xf32>, vector<16x32xf32>, vector<16x32xf32> -> vector<16x32xf32>
    %68 = vector.broadcast %63 : vector<1x32xf32> to vector<16x32xf32>
    %69 = arith.addf %67, %68 : vector<16x32xf32>
    %cst_27 = arith.constant 0.000000e+00 : f32
    %70 = vector.broadcast %cst_27 : f32 to vector<16x32xf32>
    %71 = arith.maximumf %69, %70 : vector<16x32xf32>
    %c80 = arith.constant 80 : index
    %c0_28 = arith.constant 0 : index
    %72 = vector.load %arg4[%c80, %c0_28] : memref<424x256xf32, #tpu.memory_space<vmem>>, vector<32x32xf32>
    %c112 = arith.constant 112 : index
    %c0_29 = arith.constant 0 : index
    %73 = vector.load %arg4[%c112, %c0_29] : memref<424x256xf32, #tpu.memory_space<vmem>>, vector<1x32xf32>
    %cst_30 = arith.constant dense<0.000000e+00> : vector<16x32xf32>
    %74 = tpu.matmul %71, %72, %cst_30 {dimension_numbers = #tpu.dot_dimension_numbers<[1], [0], [0], [1], [0, 0, 1, 1], [], []>} : vector<16x32xf32>, vector<32x32xf32>, vector<16x32xf32> -> vector<16x32xf32>
    %75 = vector.broadcast %52 : vector<16x1xf32> to vector<16x32xf32>
    %76 = arith.mulf %75, %74 : vector<16x32xf32>
    %cst_31 = arith.constant dense<0.000000e+00> : vector<16x32xf32>
    %77 = tpu.matmul %60, %76, %cst_31 {dimension_numbers = #tpu.dot_dimension_numbers<[1], [0], [0], [1], [0, 0, 1, 1], [], []>} : vector<16x16xf32>, vector<16x32xf32>, vector<16x32xf32> -> vector<16x32xf32>
    %78 = vector.broadcast %73 : vector<1x32xf32> to vector<16x32xf32>
    %79 = arith.addf %77, %78 : vector<16x32xf32>
    %cst_32 = arith.constant 0.000000e+00 : f32
    %80 = vector.broadcast %cst_32 : f32 to vector<16x32xf32>
    %81 = arith.maximumf %79, %80 : vector<16x32xf32>
    %c120 = arith.constant 120 : index
    %c0_33 = arith.constant 0 : index
    %82 = vector.load %arg4[%c120, %c0_33] : memref<424x256xf32, #tpu.memory_space<vmem>>, vector<32x256xf32>
    %c152 = arith.constant 152 : index
    %c0_34 = arith.constant 0 : index
    %83 = vector.load %arg4[%c152, %c0_34] : memref<424x256xf32, #tpu.memory_space<vmem>>, vector<1x256xf32>
    %c160 = arith.constant 160 : index
    %c0_35 = arith.constant 0 : index
    %84 = vector.load %arg4[%c160, %c0_35] : memref<424x256xf32, #tpu.memory_space<vmem>>, vector<256x128xf32>
    %c416 = arith.constant 416 : index
    %c0_36 = arith.constant 0 : index
    %85 = vector.load %arg4[%c416, %c0_36] : memref<424x256xf32, #tpu.memory_space<vmem>>, vector<1x128xf32>
    %cst_37 = arith.constant dense<0.000000e+00> : vector<16x256xf32>
    %86 = tpu.matmul %81, %82, %cst_37 {dimension_numbers = #tpu.dot_dimension_numbers<[1], [0], [0], [1], [0, 0, 1, 1], [], []>} : vector<16x32xf32>, vector<32x256xf32>, vector<16x256xf32> -> vector<16x256xf32>
    %87 = vector.broadcast %83 : vector<1x256xf32> to vector<16x256xf32>
    %88 = arith.addf %86, %87 : vector<16x256xf32>
    %cst_38 = arith.constant 0.000000e+00 : f32
    %89 = vector.broadcast %cst_38 : f32 to vector<16x256xf32>
    %90 = arith.maximumf %88, %89 : vector<16x256xf32>
    %cst_39 = arith.constant dense<0.000000e+00> : vector<16x128xf32>
    %91 = tpu.matmul %90, %84, %cst_39 {dimension_numbers = #tpu.dot_dimension_numbers<[1], [0], [0], [1], [0, 0, 1, 1], [], []>} : vector<16x256xf32>, vector<256x128xf32>, vector<16x128xf32> -> vector<16x128xf32>
    %92 = vector.broadcast %85 : vector<1x128xf32> to vector<16x128xf32>
    %93 = arith.addf %91, %92 : vector<16x128xf32>
    %c0_40 = arith.constant 0 : index
    %c0_41 = arith.constant 0 : index
    %94 = vector.load %arg5[%c0_40, %c0_41] : memref<16x128xf32, #tpu.memory_space<vmem>>, vector<16x128xf32>
    tpu.vector_store %arg5[%c0_40, %c0_41], %93 {strides = array<i32>} : memref<16x128xf32, #tpu.memory_space<vmem>>, vector<16x128xf32>,
    return
  }
}

</mosaic_0001>

<bundles_post_ra>
// kernel: gcn_forward.1
= control target key start
LH: loop header
LB: loop body
LE: loop exit
PB: predicated region body
PF: predicated region fallthrough
CT: control target
= control target key end

     0   :  { %vm37_vm0 = vcmask 64512   ;;  %vm211_vm1 = vcmask 130048   ;;  %v1540_v53 = vmov 0   ;;  %vm545_vm2 = vcmask 392192   ;;  %s1901_s4 = inlined_call_operand.vmem [shape: f32[424,256], index: 4, kind: input, shape index: {}]   ;;  %s1902_s1 = inlined_call_operand.vmem [shape: f32[96,8], index: 1, kind: input, shape index: {}]   ;;  %s1903_s2 = inlined_call_operand.vmem [shape: s32[48,1], index: 2, kind: input, shape index: {}]   ;;  %s1904_s3 = inlined_call_operand.vmem [shape: s32[1,48], index: 3, kind: input, shape index: {}]   ;;  %s1905_s0 = inlined_call_operand.vmem [shape: f32[16,32], index: 0, kind: input, shape index: {}]   ;;  %s1906_s5 = inlined_call_operand.vmem [shape: f32[16,128], index: 5, kind: output, shape index: {}]  }
   0x1   :  { %v20_v0 = vld [vmem:[%s1901_s4] sm:$0xff]  ;;  %v26_v2 = vld [vmem:[%s1902_s1 + $0x8] sm:$0xff]  ;;  %v27_v3 = vld [vmem:[%s1902_s1 + $0x10] sm:$0xff]  ;;  %1523 = vset.pattern.permute.xlu1 %v1540_v53  ;;  %1522 = vset.pattern.permute.xlu0 %v1540_v53  ;;  %vm652_vm4 = vcmask 261120  }
   0x2   :  { %v25_v1 = vld [vmem:[%s1902_s1] sm:$0xff]  ;;  %1345 = vmatprep.subr.mxu0 %v20_v0  ;;  %v28_v4 = vld [vmem:[%s1902_s1 + $0x18] sm:$0xff]  ;;  %v23_v6 = vld [vmem:[%s1901_s4 + $0x30] sm:$0xff] }
   0x3   :  { %1347 = vmatprep.mubr.msk.f32.mxu0 %vm37_vm0, %v25_v1  ;;  %1346 = vmatpush3.msra.mxu0 %v20_v0  ;;  %v22_v5 = vld [vmem:[%s1901_s4 + $0x20] sm:$0xff]  ;;  %v30_v9 = vld [vmem:[%s1902_s1 + $0x28] sm:$0xff]  ;;  %v31_v10 = vld [vmem:[%s1902_s1 + $0x30] sm:$0xff] }
   0x4   :  { %1348 = vmatmul.mubr.msk.f32.vlgmr.msra.gmra.mrb[0].mxu0 %vm37_vm0, %v26_v2  ;;  %v29_v7 = vld [vmem:[%s1902_s1 + $0x20] sm:$0xff]  ;;  %v1438_v8 = vpack.c.bf16 %v23_v6, %v22_v5  ;;  %v32_v11 = vld [vmem:[%s1902_s1 + $0x38] sm:$0xff]  ;;  %v34_v13 = vld [vmem:[%s1902_s1 + $0x48] sm:$0xff] }
   0x5   :  { %1350 = vmatprep.mubr.msk.f32.mxu0 %vm37_vm0, %v27_v3  ;;  %v33_v12 = vld [vmem:[%s1902_s1 + $0x40] sm:$0xff]  ;;  %v35_v14 = vld [vmem:[%s1902_s1 + $0x50] sm:$0xff]  ;;  %v36_v15 = vld [vmem:[%s1902_s1 + $0x58] sm:$0xff] }
   0x6   :  { %1439 = vmatprep.subr.bf16.mxu0 %v1438_v8  ;;  %1518 = vmatprep.subr.bf16.mxu1 %v1438_v8  ;;  %v21_v16 = vld [vmem:[%s1901_s4 + $0x10] ss:$0 sm:$0xff]  ;;  %v24_v54 = vld [vmem:[%s1901_s4 + $0x40] ss:$0 sm:$0xff] }
   0x7   :  { %1441 = vmatpush3.bf16.msra.mxu0 %v1438_v8  ;;  %1519 = vmatpush3.bf16.msra.mxu1 %v1438_v8  ;;  %v485_v53 = vld [vmem:[%s1903_s2 + $0x10] sm:$0xff] }
   0x8   :  { %1351 = vmatmul.mubr.msk.f32.gmra.mrb[2].mxu0 %vm37_vm0, %v28_v4 }
   0x9   :  { %1353 = vmatprep.mubr.msk.f32.mxu0 %vm37_vm0, %v29_v7 }
   0xc   :  { %1354 = vmatmul.mubr.msk.f32.gmra.mrb[4].mxu0 %vm37_vm0, %v30_v9 }
   0xd   :  { %1356 = vmatprep.mubr.msk.f32.mxu0 %vm37_vm0, %v31_v10 }
  0x10   :  { %1357 = vmatmul.mubr.msk.f32.gmra.mrb[6].mxu0 %vm37_vm0, %v32_v11 }
  0x11   :  { %1359 = vmatprep.mubr.msk.f32.mxu0 %vm37_vm0, %v33_v12 }
  0x14   :  { %1360 = vmatmul.mubr.msk.f32.gmra.mrb[8].mxu0 %vm37_vm0, %v34_v13 }
  0x15   :  { %1362 = vmatprep.mubr.msk.f32.mxu0 %vm37_vm0, %v35_v14 }
  0x18   :  { %1363 = vmatmul.mubr.msk.f32.gmra.mrb[10].mxu0 %vm37_vm0, %v36_v15 }
  0xd7   :  { %v1349_v17 = vpop.f32.mrb[0].mxu0 }
  0xd8   :  { %v146_v18 = vadd.f32 %v1349_v17, %v21_v16  ;;  %v140_v19 = vpop.f32.mrb[1].mxu0 }
  0xd9   :  { %v141_v20 = vadd.f32 %v140_v19, %v21_v16 }
  0xda   :  { %v200_v23 = vmax.f32 %v146_v18, 0.0 }
  0xdb   :  { %v199_v21 = vmax.f32 %v141_v20, 0.0  ;;  %v1352_v22 = vpop.f32.mrb[2].mxu0 }
  0xdc   :  { %v156_v24 = vadd.f32 %v1352_v22, %v21_v16  ;;  %v150_v25 = vpop.f32.mrb[3].mxu0 }
  0xdd   :  { %v151_v26 = vadd.f32 %v150_v25, %v21_v16  ;;  %1369 = vmatprep.mubr.msk.f32.mxu0 %vm211_vm1, %v199_v21 }
  0xde   :  { %1370 = vmatmul.mubr.msk.f32.vlgmr.msra.gmra.mrb[12].mxu0 %vm211_vm1, %v200_v23  ;;  %v202_v29 = vmax.f32 %v156_v24, 0.0 }
  0xdf   :  { %v201_v27 = vmax.f32 %v151_v26, 0.0  ;;  %v1355_v28 = vpop.f32.mrb[4].mxu0 }
  0xe0   :  { %v166_v30 = vadd.f32 %v1355_v28, %v21_v16  ;;  %v160_v31 = vpop.f32.mrb[5].mxu0 }
  0xe1   :  { %v161_v32 = vadd.f32 %v160_v31, %v21_v16  ;;  %1372 = vmatprep.mubr.msk.f32.mxu0 %vm211_vm1, %v201_v27 }
  0xe2   :  { %1373 = vmatmul.mubr.msk.f32.gmra.mrb[14].mxu0 %vm211_vm1, %v202_v29  ;;  %v204_v35 = vmax.f32 %v166_v30, 0.0 }
  0xe3   :  { %v203_v33 = vmax.f32 %v161_v32, 0.0  ;;  %v1358_v34 = vpop.f32.mrb[6].mxu0 }
  0xe4   :  { %v176_v36 = vadd.f32 %v1358_v34, %v21_v16  ;;  %v170_v37 = vpop.f32.mrb[7].mxu0 }
  0xe5   :  { %v171_v38 = vadd.f32 %v170_v37, %v21_v16  ;;  %1375 = vmatprep.mubr.msk.f32.mxu0 %vm211_vm1, %v203_v33 }
  0xe6   :  { %1376 = vmatmul.mubr.msk.f32.gmra.mrb[16].mxu0 %vm211_vm1, %v204_v35  ;;  %v206_v41 = vmax.f32 %v176_v36, 0.0 }
  0xe7   :  { %v205_v39 = vmax.f32 %v171_v38, 0.0  ;;  %v1361_v40 = vpop.f32.mrb[8].mxu0 }
  0xe8   :  { %v186_v42 = vadd.f32 %v1361_v40, %v21_v16  ;;  %v180_v43 = vpop.f32.mrb[9].mxu0 }
  0xe9   :  { %v181_v44 = vadd.f32 %v180_v43, %v21_v16  ;;  %1378 = vmatprep.mubr.msk.f32.mxu1 %vm211_vm1, %v205_v39 }
  0xea   :  { %v208_v45 = vmax.f32 %v186_v42, 0.0  ;;  %1379 = vmatmul.mubr.msk.f32.vlgmr.msra.gmra.mrb[0].mxu1 %vm211_vm1, %v206_v41 }
  0xeb   :  { %v207_v46 = vmax.f32 %v181_v44, 0.0  ;;  %v1364_v47 = vpop.f32.mrb[10].mxu0 }
  0xec   :  { %v196_v48 = vadd.f32 %v1364_v47, %v21_v16  ;;  %v190_v49 = vpop.f32.mrb[11].mxu0 }
  0xed   :  { %v191_v50 = vadd.f32 %v190_v49, %v21_v16  ;;  %1381 = vmatprep.mubr.msk.f32.mxu1 %vm211_vm1, %v207_v46 }
  0xee   :  { %v210_v51 = vmax.f32 %v196_v48, 0.0  ;;  %1382 = vmatmul.mubr.msk.f32.gmra.mrb[2].mxu1 %vm211_vm1, %v208_v45 }
  0xef   :  { %v209_v52 = vmax.f32 %v191_v50, 0.0 }
  0xf1   :  { %1384 = vmatprep.mubr.msk.f32.mxu1 %vm211_vm1, %v209_v52  ;;  %v483_v52 = vld [vmem:[%s1903_s2] sm:$0xff] }
  0xf2   :  { %1385 = vmatmul.mubr.msk.f32.gmra.mrb[4].mxu1 %vm211_vm1, %v210_v51  ;;  %v484_v51 = vld [vmem:[%s1903_s2 + $0x8] sm:$0xff] }
 0x1b1   :  { %v1371_v55 = vpop.f32.mrb[12].mxu0 }
 0x1b2   :  { %v320_v56 = vadd.f32 %v1371_v55, %v24_v54  ;;  %v314_v57 = vpop.f32.mrb[13].mxu0  ;;  %v487_v55 = vld [vmem:[%s1903_s2 + $0x20] sm:$0xff] }
 0x1b3   :  { %v315_v58 = vadd.f32 %v314_v57, %v24_v54  ;;  %v481_v57 = vlaneseq }
 0x1b4   :  { %v398_v59 = vmul.f32 %v320_v56, %v320_v56 }
 0x1b5   :  { %v1374_v60 = vpop.f32.mrb[14].mxu0  ;;  %v397_v0 = vmul.f32 %v315_v58, %v315_v58 }
 0x1b6   :  { %v330_v61 = vadd.f32 %v1374_v60, %v24_v54  ;;  %v324_v62 = vpop.f32.mrb[15].mxu0  ;;  %v406_v63 = vsel %vm211_vm1, %v398_v59, 0.0  ;;  %v1689_v59 = vld [vmem:[%s1904_s3] ss:$0 sm:$0xff]  ;;  %v1541_v60 = vmov 0.0  }
 0x1b7   :  { %v325_v1 = vadd.f32 %v324_v62, %v24_v54  ;;  %407 = vadd.xlane.f32.xlu0 %v406_v63  ;;  %v403_v7 = vsel %vm211_vm1, %v397_v0, 0.0  ;;  %v647_v62 = vld [vmem:[%s1901_s4 + $0x50] sm:$0xff]  ;;  %v648_v63 = vld [vmem:[%s1901_s4 + $0x60] sm:$0xff] }
 0x1b8   :  { %v400_v2 = vmul.f32 %v330_v61, %v330_v61  ;;  %v649_v0 = vld [vmem:[%s1901_s4 + $0x70] sm:$0xff] }
 0x1b9   :  { %v1377_v3 = vpop.f32.mrb[16].mxu0  ;;  %v399_v8 = vmul.f32 %v325_v1, %v325_v1 }
 0x1ba   :  { %v340_v4 = vadd.f32 %v1377_v3, %v24_v54  ;;  %v334_v5 = vpop.f32.mrb[17].mxu0  ;;  %v412_v6 = vsel %vm211_vm1, %v400_v2, 0.0  ;;  %v650_v2 = vld [vmem:[%s1901_s4 + $0x80] sm:$0xff] }
 0x1bb   :  { %v335_v9 = vadd.f32 %v334_v5, %v24_v54  ;;  %413 = vadd.xlane.f32.xlu1 %v412_v6  ;;  %404 = vadd.xlane.f32.xlu0 %v403_v7  ;;  %v409_v15 = vsel %vm211_vm1, %v399_v8, 0.0  ;;  %v645_v3 = vld [vmem:[%s1905_s0] sm:$0xff]  ;;  %v646_v5 = vld [vmem:[%s1905_s0 + $0x8] sm:$0xff] }
 0x1bc   :  { %v402_v10 = vmul.f32 %v340_v4, %v340_v4  ;;  %1410 = vmatprep.mubr.msk.f32.mxu1 %vm652_vm4, %v645_v3 }
 0x1bd   :  { %v1380_v11 = vpop.f32.mrb[0].mxu1  ;;  %v401_v16 = vmul.f32 %v335_v9, %v335_v9 }
 0x1be   :  { %v350_v12 = vadd.f32 %v1380_v11, %v24_v54  ;;  %v344_v13 = vpop.f32.mrb[1].mxu1  ;;  %v418_v14 = vsel %vm211_vm1, %v402_v10, 0.0 }
 0x1bf   :  { %v345_v17 = vadd.f32 %v344_v13, %v24_v54  ;;  %419 = vadd.xlane.f32.xlu1 %v418_v14  ;;  %410 = vadd.xlane.f32.xlu0 %v409_v15  ;;  %v415_v25 = vsel %vm211_vm1, %v401_v16, 0.0 }
 0x1c0   :  { %v422_v18 = vmul.f32 %v350_v12, %v350_v12  ;;  %v374_v19 = vmul.f32 %v350_v12, %v320_v56  ;;  %v488_v56 = vld [vmem:[%s1903_s2 + $0x28] sm:$0xff] }
 0x1c1   :  { %v1383_v20 = vpop.f32.mrb[2].mxu1  ;;  %v373_v21 = vmul.f32 %v345_v17, %v315_v58  ;;  %v421_v35 = vmul.f32 %v345_v17, %v345_v17  ;;  %v1684_v58 = vshrl.u32 %v481_v57, 7 }
 0x1c2   :  { %v360_v22 = vadd.f32 %v1383_v20, %v24_v54  ;;  %v354_v23 = vpop.f32.mrb[3].mxu1  ;;  %v430_v24 = vsel %vm211_vm1, %v422_v18, 0.0  ;;  %v382_v33 = vsel %vm211_vm1, %v374_v19, 0.0 }
 0x1c3   :  { %v355_v26 = vadd.f32 %v354_v23, %v24_v54  ;;  %431 = vadd.xlane.f32.xlu1 %v430_v24  ;;  %416 = vadd.xlane.f32.xlu0 %v415_v25  ;;  %v379_v34 = vsel %vm211_vm1, %v373_v21, 0.0  ;;  %v427_v40 = vsel %vm211_vm1, %v421_v35, 0.0  ;;  %vm533_vm3 = vcmp.eq.s32.totalorder %v1689_v59, %v1684_v58 }
 0x1c4   :  { %v376_v27 = vmul.f32 %v360_v22, %v330_v61  ;;  %v424_v41 = vmul.f32 %v360_v22, %v360_v22  ;;  %v1237_v61 = vsel %vm533_vm3, 1.0, %v1541_v60 }
 0x1c5   :  { %v1386_v28 = vpop.f32.mrb[4].mxu1  ;;  %v423_v29 = vmul.f32 %v355_v26, %v355_v26  ;;  %v375_v30 = vmul.f32 %v355_v26, %v325_v1  ;;  %1399 = vmatprep.mubr.msk.f32.mxu0 %vm545_vm2, %v1237_v61  ;;  %v1454_v1 = vpack.c.bf16 %v648_v63, %v647_v62 }
 0x1c6   :  { %v370_v31 = vadd.f32 %v1386_v28, %v24_v54  ;;  %v364_v32 = vpop.f32.mrb[5].mxu1  ;;  %v436_v43 = vsel %vm211_vm1, %v424_v41, 0.0  ;;  %v388_v46 = vsel %vm211_vm1, %v376_v27, 0.0 }
 0x1c7   :  { %v365_v36 = vadd.f32 %v364_v32, %v24_v54  ;;  %383 = vadd.xlane.f32.xlu1 %v382_v33  ;;  %380 = vadd.xlane.f32.xlu0 %v379_v34  ;;  %v433_v37 = vsel %vm211_vm1, %v423_v29, 0.0  ;;  %v385_v44 = vsel %vm211_vm1, %v375_v30, 0.0  ;;  %v486_v54 = vld [vmem:[%s1903_s2 + $0x18] sm:$0xff] }
 0x1c8   :  { %v378_v38 = vmul.f32 %v370_v31, %v340_v4  ;;  %v426_v47 = vmul.f32 %v370_v31, %v370_v31  ;;  %v1458_v4 = vpack.c.bf16 %v650_v2, %v649_v0  ;;  %1455 = vmatprep.subr.bf16.mxu1 %v1454_v1 }
 0x1c9   :  { %v377_v39 = vmul.f32 %v365_v36, %v335_v9  ;;  %v425_v42 = vmul.f32 %v365_v36, %v365_v36  ;;  %1457 = vmatpush3.bf16.msra.mxu1 %v1454_v1 }
 0x1ca   :  { %v442_v48 = vsel %vm211_vm1, %v426_v47, 0.0  ;;  %v394_v50 = vsel %vm211_vm1, %v378_v38, 0.0  ;;  %1459 = vmatprep.subr.bf16.mxu1 %v1458_v4 }
 0x1cb   :  { %428 = vadd.xlane.f32.xlu1 %v427_v40  ;;  %434 = vadd.xlane.f32.xlu0 %v433_v37  ;;  %v439_v45 = vsel %vm211_vm1, %v425_v42, 0.0  ;;  %v391_v49 = vsel %vm211_vm1, %v377_v39, 0.0  ;;  %v1716_v42 = vand.u32 127, %v481_v57 }
 0x1cd   :  { %1461 = vmatpush3.bf16.msra.mxu1 %v1458_v4  ;;  %vm639_vm12 = vcmp.eq.s32.totalorder %v1684_v58, %v1716_v42 }
 0x1cf   :  { %437 = vadd.xlane.f32.xlu1 %v436_v43  ;;  %386 = vadd.xlane.f32.xlu0 %v385_v44 }
 0x1d0   :  { %1411 = vmatmul.mubr.msk.f32.vlgmr.msra.gmra.mrb[6].mxu1 %vm652_vm4, %v646_v5 }
 0x1d3   :  { %389 = vadd.xlane.f32.xlu1 %v388_v46  ;;  %440 = vadd.xlane.f32.xlu0 %v439_v45 }
 0x1d7   :  { %443 = vadd.xlane.f32.xlu1 %v442_v48  ;;  %392 = vadd.xlane.f32.xlu0 %v391_v49 }
 0x1db   :  { %395 = vadd.xlane.f32.xlu1 %v394_v50 }
 0x1ec   :  { %493 = vperm.xlu1 %1523, %v484_v51  }
 0x1ed   :  { %490 = vperm.xlu0 %1522, %v483_v52  }
 0x1f0   :  { %496 = vperm.xlu1 %1523, %v485_v53  }
 0x1f4   :  { %499 = vperm.xlu1 %1523, %v486_v54  }
 0x1f8   :  { %502 = vperm.xlu1 %1523, %v487_v55  }
 0x1fc   :  { %505 = vperm.xlu1 %1523, %v488_v56  }
 0x244   :  { %v408_v6 = vpop.xlane.xlu0 %407 }
 0x248   :  { %v414_v7 = vpop.xlane.xlu1 %413  ;;  %v405_v8 = vpop.xlane.xlu0 %404 }
 0x24c   :  { %v420_v9 = vpop.xlane.xlu1 %419  ;;  %v411_v10 = vpop.xlane.xlu0 %410 }
 0x250   :  { %v432_v11 = vpop.xlane.xlu1 %431  ;;  %v417_v12 = vpop.xlane.xlu0 %416 }
 0x251   :  { %v446_v13 = vmul.f32 %v432_v11, %v408_v6 }
 0x253   :  { %v452_v14 = vadd.f32 1e-16, %v446_v13 }
 0x254   :  { %v384_v15 = vpop.xlane.xlu1 %383  ;;  %v381_v16 = vpop.xlane.xlu0 %380 }
 0x255   :  { %1524 = vrsqrt.f32 %v452_v14 }
 0x258   :  { %v429_v17 = vpop.xlane.xlu1 %428  ;;  %v435_v18 = vpop.xlane.xlu0 %434 }
 0x259   :  { %v445_v19 = vmul.f32 %v429_v17, %v405_v8  ;;  %v447_v20 = vmul.f32 %v435_v18, %v411_v10  ;;  %v527_v17 = vadd.s32 8, %v1684_v58 }
 0x25b   :  { %v451_v21 = vadd.f32 1e-16, %v445_v19  ;;  %v453_v22 = vadd.f32 1e-16, %v447_v20  ;;  %vm534_vm11 = vcmp.eq.s32.totalorder %v1689_v59, %v527_v17  ;;  %v819_v59 = vld [vmem:[%s1901_s4 + $0xa0] sm:$0xff]  ;;  %vm640_vm13 = vcmp.eq.s32.totalorder %v527_v17, %v1716_v42 }
 0x25c   :  { %v438_v23 = vpop.xlane.xlu1 %437  ;;  %v387_v24 = vpop.xlane.xlu0 %386  ;;  %v1012_v17 = vld [vmem:[%s1901_s4 + $0x260] sm:$0xff] }
 0x25d   :  { %1526 = vrsqrt.f32 %v451_v21  ;;  %v448_v25 = vmul.f32 %v438_v23, %v414_v7 }
 0x25e   :  { %1528 = vrsqrt.f32 %v453_v22  ;;  %v1238_v22 = vsel %vm534_vm11, 1.0, %v1541_v60 }
 0x25f   :  { %v454_v26 = vadd.f32 1e-16, %v448_v25  ;;  %v1525_v30 = vpop.eup %1524 }
 0x260   :  { %v390_v27 = vpop.xlane.xlu1 %389  ;;  %v441_v28 = vpop.xlane.xlu0 %440  ;;  %v464_v33 = vmul.f32 %v1525_v30, %v384_v15 }
 0x261   :  { %1530 = vrsqrt.f32 %v454_v26  ;;  %v449_v29 = vmul.f32 %v441_v28, %v417_v12 }
 0x262   :  { %v470_v41 = vadd.f32 1.0, %v464_v33 }
 0x263   :  { %v455_v31 = vadd.f32 1e-16, %v449_v29  ;;  %v820_v29 = vld [vmem:[%s1901_s4 + $0xb0] sm:$0xff] }
 0x264   :  { %v444_v32 = vpop.xlane.xlu1 %443  ;;  %v393_v37 = vpop.xlane.xlu0 %392  ;;  %v476_v49 = vmul.f32 0.5, %v470_v41  ;;  %v1466_v30 = vpack.c.bf16 %v820_v29, %v819_v59  ;;  %v1016_v59 = vld [vmem:[%s1901_s4 + $0x2a0] sm:$0xff]  ;;  %v1017_v29 = vld [vmem:[%s1901_s4 + $0x2b0] sm:$0xff] }
 0x265   :  { %v450_v34 = vmul.f32 %v444_v32, %v420_v9  ;;  %1532 = vrsqrt.f32 %v455_v31 }
 0x266   :  { %1467 = vmatprep.subr.bf16.mxu1 %v1466_v30 }
 0x267   :  { %v1527_v35 = vpop.eup %1526  ;;  %v456_v36 = vadd.f32 1e-16, %v450_v34  ;;  %1469 = vmatpush3.bf16.msra.mxu1 %v1466_v30 }
 0x268   :  { %v396_v38 = vpop.xlane.xlu1 %395  ;;  %v463_v39 = vmul.f32 %v1527_v35, %v381_v16  ;;  %v1529_v40 = vpop.eup %1528 }
 0x269   :  { %1534 = vrsqrt.f32 %v456_v36  ;;  %v465_v45 = vmul.f32 %v1529_v40, %v387_v24 }
 0x26a   :  { %v469_v43 = vadd.f32 1.0, %v463_v39 }
 0x26b   :  { %v1531_v44 = vpop.eup %1530  ;;  %v471_v55 = vadd.f32 1.0, %v465_v45 }
 0x26c   :  { %v494_v46 = vpop.permute.xlu1 %493  ;;  %v475_v47 = vmul.f32 0.5, %v469_v43  ;;  %v491_v48 = vpop.permute.xlu0 %490  ;;  %v466_v50 = vmul.f32 %v1531_v44, %v390_v27 }
 0x26d   :  { %vm508_vm5 = vcmp.eq.s32.totalorder %v494_v46, %v1716_v42  ;;  %vm507_vm6 = vcmp.eq.s32.totalorder %v491_v48, %v1716_v42  ;;  %v477_v0 = vmul.f32 0.5, %v471_v55  ;;  %v822_v48 = vld [vmem:[%s1901_s4 + $0xd0] sm:$0xff] }
 0x26e   :  { %v1231_v51 = vsel %vm508_vm5, 1.0, %v1541_v60  ;;  %v1230_v52 = vsel %vm507_vm6, 1.0, %v1541_v60  ;;  %v472_v57 = vadd.f32 1.0, %v466_v50 }
 0x26f   :  { %v540_v53 = vmul.f32 %v1231_v51, %v476_v49  ;;  %v539_v54 = vmul.f32 %v1230_v52, %v475_v47  ;;  %v1533_v62 = vpop.eup %1532  ;;  %v821_v47 = vld [vmem:[%s1901_s4 + $0xc0] sm:$0xff] }
 0x270   :  { %v497_v56 = vpop.permute.xlu1 %496  ;;  %v478_v3 = vmul.f32 0.5, %v472_v57  ;;  %v467_v4 = vmul.f32 %v1533_v62, %v393_v37  ;;  %v1470_v49 = vpack.c.bf16 %v822_v48, %v821_v47  ;;  %v985_v62 = vld [vmem:[%s1901_s4 + $0xf8] sm:$0xff]  ;;  %v1022_v47 = vld [vmem:[%s1901_s4 + $0x300] sm:$0xff]  ;;  %v1023_v48 = vld [vmem:[%s1901_s4 + $0x310] sm:$0xff] }
 0x271   :  { %vm509_vm7 = vcmp.eq.s32.totalorder %v497_v56, %v1716_v42  ;;  %v1442_v61 = vpack.c.bf16 %v540_v53, %v539_v54 }
 0x272   :  { %v1232_v1 = vsel %vm509_vm7, 1.0, %v1541_v60  ;;  %v473_v10 = vadd.f32 1.0, %v467_v4  ;;  %1471 = vmatprep.subr.bf16.mxu1 %v1470_v49  ;;  %v986_v4 = vld [vmem:[%s1901_s4 + $0x100] sm:$0xff] }
 0x273   :  { %v1535_v63 = vpop.eup %1534  ;;  %1443 = vmatprep.subr.bf16.mxu0 %v1442_v61  ;;  %v541_v7 = vmul.f32 %v1232_v1, %v477_v0  ;;  %1473 = vmatpush3.bf16.msra.mxu1 %v1470_v49 }
 0x274   :  { %v500_v2 = vpop.permute.xlu1 %499  ;;  %1445 = vmatpush3.bf16.msra.mxu0 %v1442_v61  ;;  %v468_v5 = vmul.f32 %v1535_v63, %v396_v38  ;;  %v479_v15 = vmul.f32 0.5, %v473_v10  ;;  %v987_v63 = vld [vmem:[%s1901_s4 + $0x108] sm:$0xff]  ;;  %v990_v10 = vld [vmem:[%s1901_s4 + $0x120] sm:$0xff] }
 0x275   :  { %vm510_vm8 = vcmp.eq.s32.totalorder %v500_v2, %v1716_v42  ;;  %v1478_v2 = vpack.c.bf16 %v987_v63, %v985_v62  ;;  %v1024_v63 = vld [vmem:[%s1901_s4 + $0x320] sm:$0xff] }
 0x276   :  { %v1233_v6 = vsel %vm510_vm8, 1.0, %v1541_v60  ;;  %v474_v11 = vadd.f32 1.0, %v468_v5 }
 0x277   :  { %v542_v8 = vmul.f32 %v1233_v6, %v478_v3  ;;  %v984_v3 = vld [vmem:[%s1901_s4 + $0xf0] sm:$0xff]  ;;  %v989_v6 = vld [vmem:[%s1901_s4 + $0x118] sm:$0xff] }
 0x278   :  { %v503_v9 = vpop.permute.xlu1 %502  ;;  %v480_v16 = vmul.f32 0.5, %v474_v11  ;;  %v1480_v5 = vpack.c.bf16 %v986_v4, %v984_v3  ;;  %v1030_v4 = vsub.s32 0, %v1684_v58 }
 0x279   :  { %vm511_vm9 = vcmp.eq.s32.totalorder %v503_v9, %v1716_v42  ;;  %v1446_v12 = vpack.c.bf16 %v542_v8, %v541_v7  ;;  %v991_v7 = vld [vmem:[%s1901_s4 + $0x128] sm:$0xff]  ;;  %v988_v9 = vld [vmem:[%s1901_s4 + $0x110] sm:$0xff] }
 0x27a   :  { %v1234_v13 = vsel %vm511_vm9, 1.0, %v1541_v60  ;;  %v1482_v8 = vpack.c.bf16 %v991_v7, %v989_v6  ;;  %v1484_v11 = vpack.c.bf16 %v990_v10, %v988_v9  ;;  %v1034_v6 = vsub.s32 1, %v1684_v58  ;;  %v1026_v58 = vld [vmem:[%s1901_s4 + $0x340] ss:$0 sm:$0xff] }
 0x27b   :  { %1447 = vmatprep.subr.bf16.mxu0 %v1446_v12  ;;  %v543_v19 = vmul.f32 %v1234_v13, %v479_v15  ;;  %v1011_v13 = vld [vmem:[%s1901_s4 + $0x250] sm:$0xff] }
 0x27c   :  { %v506_v14 = vpop.permute.xlu1 %505  ;;  %1449 = vmatpush3.bf16.msra.mxu0 %v1446_v12  ;;  %v1010_v12 = vld [vmem:[%s1901_s4 + $0x240] sm:$0xff] }
 0x27d   :  { %vm512_vm10 = vcmp.eq.s32.totalorder %v506_v14, %v1716_v42  ;;  %v651_v42 = vld [vmem:[%s1901_s4 + $0x90] ss:$0 sm:$0xff]  ;;  %v994_v14 = vld [vmem:[%s1901_s4 + $0x140] sm:$0xff]  ;;  %v1486_v15 = vpack.c.bf16 %v1011_v13, %v1010_v12 }
 0x27e   :  { %v1235_v18 = vsel %vm512_vm10, 1.0, %v1541_v60 }
 0x27f   :  { %v544_v20 = vmul.f32 %v1235_v18, %v480_v16  ;;  %v995_v16 = vld [vmem:[%s1901_s4 + $0x150] sm:$0xff]  ;;  %1487 = vmatprep.subr.bf16.mxu1 %v1486_v15 }
 0x280   :  { %v1013_v18 = vld [vmem:[%s1901_s4 + $0x270] sm:$0xff] }
 0x281   :  { %v1450_v21 = vpack.c.bf16 %v544_v20, %v543_v19  ;;  %v1488_v19 = vpack.c.bf16 %v995_v16, %v994_v14  ;;  %v1490_v20 = vpack.c.bf16 %v1013_v18, %v1012_v17 }
 0x283   :  { %1451 = vmatprep.subr.bf16.mxu0 %v1450_v21 }
 0x284   :  { %1453 = vmatpush3.bf16.msra.mxu0 %v1450_v21  ;;  %v996_v21 = vld [vmem:[%s1901_s4 + $0x160] sm:$0xff] }
 0x287   :  { %1400 = vmatmul.mubr.msk.f32.vlgmr.msra.gmra.mrb[18].mxu0 %vm545_vm2, %v1238_v22  ;;  %v997_v22 = vld [vmem:[%s1901_s4 + $0x170] sm:$0xff] }
 0x2a3   :  { %v1412_v27 = vpop.f32.mrb[6].mxu1 }
 0x2a4   :  { %v725_v28 = vpop.f32.mrb[7].mxu1 }
 0x35a   :  { %v1401_v23 = vpop.f32.mrb[18].mxu0 }
 0x35b   :  { %v618_v24 = vpop.f32.mrb[19].mxu0  ;;  %v630_v25 = vsel %vm211_vm1, %v1401_v23, 0.0 }
 0x35c   :  { %631 = vadd.xlane.f32.xlu0 %v630_v25  ;;  %v627_v26 = vsel %vm211_vm1, %v618_v24, 0.0  ;;  %v1492_v25 = vpack.c.bf16 %v997_v22, %v996_v21 }
 0x35d   :  { %628 = vadd.xlane.f32.xlu1 %v627_v26 }
 0x3e9   :  { %v632_v31 = vpop.xlane.xlu0 %631 }
 0x3ea   :  { %v634_v32 = vadd.f32 1.0, %v632_v31  ;;  %v629_v33 = vpop.xlane.xlu1 %628  ;;  %v1498_v31 = vpack.c.bf16 %v1017_v29, %v1016_v59 }
 0x3eb   :  { %v633_v34 = vadd.f32 1.0, %v629_v33  ;;  %v1001_v33 = vld [vmem:[%s1901_s4 + $0x1b0] sm:$0xff] }
 0x3ec   :  { %1536 = vrsqrt.f32 %v634_v32  ;;  %v1000_v32 = vld [vmem:[%s1901_s4 + $0x1a0] sm:$0xff] }
 0x3ed   :  { %1538 = vrsqrt.f32 %v633_v34  ;;  %v1018_v34 = vld [vmem:[%s1901_s4 + $0x2c0] sm:$0xff] }
 0x3f6   :  { %v1537_v35 = vpop.eup %1536 }
 0x3f7   :  { %v1539_v36 = vpop.eup %1538  ;;  %v735_v37 = vmul.f32 %v1537_v35, %v1412_v27  ;;  %v638_v38 = vmul.f32 %v1537_v35, %v1401_v23  ;;  %v1014_v23 = vld [vmem:[%s1901_s4 + $0x280] sm:$0xff] }
 0x3f8   :  { %v734_v39 = vmul.f32 %v1539_v36, %v725_v28  ;;  %v637_v40 = vmul.f32 %v1539_v36, %v618_v24  ;;  %v1015_v24 = vld [vmem:[%s1901_s4 + $0x290] sm:$0xff]  ;;  %v998_v27 = vld [vmem:[%s1901_s4 + $0x180] sm:$0xff] }
 0x3f9   :  { %v642_v44 = vadd.f32 %v1537_v35, %v638_v38  ;;  %v1494_v26 = vpack.c.bf16 %v1015_v24, %v1014_v23  ;;  %v999_v28 = vld [vmem:[%s1901_s4 + $0x190] sm:$0xff] }
 0x3fa   :  { %v1462_v41 = vpack.c.bf16 %v735_v37, %v734_v39  ;;  %v641_v43 = vadd.f32 %v1539_v36, %v637_v40  ;;  %v1496_v30 = vpack.c.bf16 %v999_v28, %v998_v27  ;;  %v1003_v39 = vld [vmem:[%s1901_s4 + $0x1d0] sm:$0xff] }
 0x3fb   :  { %v644_v46 = vsel %vm640_vm13, %v642_v44, %v638_v38  ;;  %v1002_v38 = vld [vmem:[%s1901_s4 + $0x1c0] sm:$0xff] }
 0x3fc   :  { %1463 = vmatprep.subr.bf16.mxu0 %v1462_v41  ;;  %v643_v45 = vsel %vm639_vm12, %v641_v43, %v637_v40  ;;  %v1020_v40 = vld [vmem:[%s1901_s4 + $0x2e0] sm:$0xff]  ;;  %v1504_v43 = vpack.c.bf16 %v1003_v39, %v1002_v38 }
 0x3fd   :  { %1465 = vmatpush3.bf16.msra.mxu0 %v1462_v41  ;;  %1417 = vmatprep.mubr.msk.f32.mxu0 %vm211_vm1, %v643_v45  ;;  %v1021_v41 = vld [vmem:[%s1901_s4 + $0x2f0] sm:$0xff] }
 0x3fe   :  { %v1506_v44 = vpack.c.bf16 %v1021_v41, %v1020_v40 }
 0x400   :  { %1418 = vmatmul.mubr.msk.f32.vlgmr.msra.gmra.mrb[20].mxu0 %vm211_vm1, %v644_v46 }
 0x401   :  { %1435 = vmatprep.mubr.msk.f32.mxu0 %vm211_vm1, %v643_v45  ;;  %v1004_v45 = vld [vmem:[%s1901_s4 + $0x1e0] sm:$0xff] }
 0x4d3   :  { %v1419_v50 = vpop.f32.mrb[20].mxu0 }
 0x4d4   :  { %v814_v51 = vadd.f32 %v1419_v50, %v651_v42  ;;  %v808_v52 = vpop.f32.mrb[21].mxu0  ;;  %v823_v50 = vld [vmem:[%s1901_s4 + $0xe0] ss:$0 sm:$0xff] }
 0x4d5   :  { %v809_v53 = vadd.f32 %v808_v52, %v651_v42  ;;  %v1510_v42 = vpack.c.bf16 %v1023_v48, %v1022_v47 }
 0x4d6   :  { %v818_v55 = vmax.f32 %v814_v51, 0.0 }
 0x4d7   :  { %v817_v54 = vmax.f32 %v809_v53, 0.0 }
 0x4d9   :  { %1428 = vmatprep.mubr.msk.f32.mxu1 %vm652_vm4, %v817_v54 }
 0x4da   :  { %1429 = vmatmul.mubr.msk.f32.vlgmr.msra.gmra.mrb[8].mxu1 %vm652_vm4, %v818_v55 }
 0x4db   :  { %1489 = vmatpush3.bf16.msra.mxu1 %v1488_v19 }
 0x4dc   :  { %1491 = vmatprep.subr.bf16.mxu1 %v1490_v20 }
 0x4df   :  { %1493 = vmatpush3.bf16.msra.mxu1 %v1492_v25 }
 0x4e0   :  { %1495 = vmatprep.subr.bf16.mxu1 %v1494_v26 }
 0x4e3   :  { %1497 = vmatpush3.bf16.msra.mxu1 %v1496_v30 }
 0x4e4   :  { %1499 = vmatprep.subr.bf16.mxu1 %v1498_v31 }
 0x5ad   :  { %v1430_v56 = vpop.f32.mrb[8].mxu1 }
 0x5ae   :  { %v906_v57 = vmul.f32 %v1537_v35, %v1430_v56  ;;  %v896_v61 = vpop.f32.mrb[9].mxu1  ;;  %v1019_v35 = vld [vmem:[%s1901_s4 + $0x2d0] sm:$0xff] }
 0x5af   :  { %v905_v0 = vmul.f32 %v1539_v36, %v896_v61  ;;  %v1500_v36 = vpack.c.bf16 %v1001_v33, %v1000_v32  ;;  %v1502_v37 = vpack.c.bf16 %v1019_v35, %v1018_v34  ;;  %v1007_v61 = vld [vmem:[%s1901_s4 + $0x210] sm:$0xff] }
 0x5b1   :  { %v1474_v1 = vpack.c.bf16 %v906_v57, %v905_v0  ;;  %1501 = vmatpush3.bf16.msra.mxu1 %v1500_v36  ;;  %v1006_v57 = vld [vmem:[%s1901_s4 + $0x200] sm:$0xff] }
 0x5b2   :  { %1503 = vmatprep.subr.bf16.mxu1 %v1502_v37  ;;  %v1512_v62 = vpack.c.bf16 %v1007_v61, %v1006_v57 }
 0x5b3   :  { %1475 = vmatprep.subr.bf16.mxu0 %v1474_v1 }
 0x5b4   :  { %1477 = vmatpush3.bf16.msra.mxu0 %v1474_v1  ;;  %v1008_v1 = vld [vmem:[%s1901_s4 + $0x220] sm:$0xff] }
 0x5b5   :  { %1479 = vmatprep.subr.bf16.mxu0 %v1478_v2  ;;  %1505 = vmatpush3.bf16.msra.mxu1 %v1504_v43  ;;  %v1009_v2 = vld [vmem:[%s1901_s4 + $0x230] sm:$0xff] }
 0x5b6   :  { %1507 = vmatprep.subr.bf16.mxu1 %v1506_v44  ;;  %v1516_v3 = vpack.c.bf16 %v1009_v2, %v1008_v1 }
 0x5b7   :  { %1436 = vmatmul.mubr.msk.f32.vlgmr.msra.gmra.mrb[22].mxu0 %vm211_vm1, %v644_v46  ;;  %v1005_v46 = vld [vmem:[%s1901_s4 + $0x1f0] sm:$0xff] }
 0x5b8   :  { %1481 = vmatpush1.bf16.msra.mxu0 %v1480_v5  ;;  %1108 = vmatprep.mubr.f32.mxu0 %v1541_v60  ;;  %v1508_v49 = vpack.c.bf16 %v1005_v46, %v1004_v45  ;;  %v1249_v5 = vld [vmem:[%s1901_s4 + $0x130] ss:$8 sm:$0x3] }
 0x5b9   :  { %1483 = vmatprep.subr.bf16.mxu0 %v1482_v8  ;;  %v1031_v7 = vrot.slane %v1249_v5, %v1030_v4  ;;  %v1035_v8 = vrot.slane %v1249_v5, %v1034_v6 }
 0x5ba   :  { %1509 = vmatpush3.bf16.msra.mxu1 %v1508_v49 }
 0x5bb   :  { %1511 = vmatprep.subr.bf16.mxu1 %v1510_v42 }
 0x5bc   :  { %1485 = vmatpush1.bf16.msra.mxu0 %v1484_v11 }
 0x5be   :  { %1513 = vmatpush3.bf16.msra.mxu1 %v1512_v62 }
 0x68a   :  { %v1437_v51 = vpop.f32.mrb[22].mxu0 }
 0x68b   :  { %v973_v52 = vpop.f32.mrb[23].mxu0  ;;  %v979_v54 = vadd.f32 %v1437_v51, %v823_v50 }
 0x68c   :  { %v974_v53 = vadd.f32 %v973_v52, %v823_v50 }
 0x68d   :  { %v983_v56 = vmax.f32 %v979_v54, 0.0 }
 0x68e   :  { %v982_v55 = vmax.f32 %v974_v53, 0.0 }
 0x690   :  { %1250 = vmatmul.mubr.msk.f32.vlgmr.msra.gmra.mrb[24].mxu0 %vm652_vm4, %v982_v55 }
 0x691   :  { %1114 = vmatprep.mubr.f32.mxu0 %v1541_v60  ;;  %v1025_v60 = vld [vmem:[%s1901_s4 + $0x330] sm:$0xff] }
 0x692   :  { %v1514_v0 = vpack.c.bf16 %v1025_v60, %v1024_v63 }
 0x694   :  { %1251 = vmatmul.mubr.msk.f32.gmra.mrb[26].mxu0 %vm652_vm4, %v983_v56  ;;  %1515 = vmatprep.subr.bf16.mxu1 %v1514_v0 }
 0x695   :  { %1517 = vmatpush3.bf16.msra.mxu1 %v1516_v3 }
 0x763   :  { %v1110_v9 = vpop.f32.mrb[24].mxu0 }
 0x764   :  { %v1111_v10 = vadd.f32 %v1110_v9, %v1031_v7  ;;  %v1112_v11 = vpop.f32.mrb[25].mxu0 }
 0x765   :  { %v1113_v12 = vadd.f32 %v1112_v11, %v1035_v8 }
 0x766   :  { %v1121_v15 = vmax.f32 %v1111_v10, 0.0 }
 0x767   :  { %v1122_v13 = vmax.f32 %v1113_v12, 0.0  ;;  %v1116_v14 = vpop.f32.mrb[26].mxu0 }
 0x768   :  { %v1117_v16 = vadd.f32 %v1116_v14, %v1031_v7  ;;  %v1118_v17 = vpop.f32.mrb[27].mxu0 }
 0x769   :  { %v1119_v18 = vadd.f32 %v1118_v17, %v1035_v8  ;;  %1189 = vmatprep.mubr.f32.mxu1 %v1122_v13 }
 0x76a   :  { %1190 = vmatmul.mubr.f32.vlgmr.msra.gmra.mrb[10].mxu1 %v1121_v15  ;;  %v1123_v20 = vmax.f32 %v1117_v16, 0.0 }
 0x76b   :  { %v1124_v19 = vmax.f32 %v1119_v18, 0.0 }
 0x76d   :  { %1194 = vmatprep.mubr.f32.mxu1 %v1124_v19 }
 0x76e   :  { %1195 = vmatmul.mubr.f32.gmra.mrb[12].mxu1 %v1123_v20 }
 0x83d   :  { %v1339_v21 = vpop.f32.mrb[10].mxu1 }
 0x83e   :  { %v1340_v22 = vpop.f32.mrb[11].mxu1 }
 0x83f   :  { %v1341_v23 = vadd.f32 %v1340_v22, %v1339_v21 }
 0x841   :  { %v1192_v24 = vadd.f32 %v1341_v23, %v1026_v58  ;;  %v1342_v25 = vpop.f32.mrb[12].mxu1 }
 0x842   :  { %v1343_v26 = vpop.f32.mrb[13].mxu1 }
 0x843   :  { %1200 = vst [vmem:[%s1906_s5] sm:$0xff] %v1192_v24  ;;  %v1344_v27 = vadd.f32 %v1343_v26, %v1342_v25 }
 0x845   :  { %v1197_v28 = vadd.f32 %v1344_v27, %v1026_v58 }
 0x847   :  { %1201 = vst [vmem:[%s1906_s5 + $0x8] sm:$0xff] %v1197_v28 }

</bundles_post_ra>
